<compile_context>
chip_gen: v6e
topology: v6e:2x2x1
jax: 0.10.0
libtpu: 0.0.40
codegen_flags: <defaults>
</compile_context>

<pallas_src>
import jax
import jax.numpy as jnp
from jax.experimental import pallas as pl
from jax.experimental.pallas import tpu as pltpu


def _adjust_kernel(w_ref, x_ref, shift_ref, o_ref):
    # w_ref:     (C_out, C_in)  1x1-conv weight with BN scale pre-folded in
    # x_ref:     (C_in, HW)     one image: channels on sublanes, pixels on lanes
    # shift_ref: (C_out, 1)     folded BN shift = beta - mean * scale
    # o_ref:     (C_out, HW)
    y = jnp.dot(w_ref[...], x_ref[...], preferred_element_type=jnp.float32)
    o_ref[...] = (y + shift_ref[...]).astype(o_ref.dtype)


def adjust_layer_forward(x_nchw, conv_w, gamma, beta, running_mean, running_var,
                         center_size=7, eps=1e-5, compute_dtype=None):
    """Forward pass of AdjustLayer (eval-mode BatchNorm).

    x_nchw : (N, C_in, H, W)
    conv_w : (C_out, C_in, 1, 1)   (PyTorch Conv2d weight layout)
    BN params: (C_out,) each.
    compute_dtype: optional dtype (e.g. jnp.bfloat16) for the matmul inputs on
                   real-sized channel counts; accumulation stays f32.
    """
    N, C_in, H, W = x_nchw.shape
    C_out = conv_w.shape[0]
    out_dtype = x_nchw.dtype

    # --- crop first (commutes with the pointwise 1x1 conv + BN) ---
    if W < 20:
        l = (W - center_size) // 2
        r = l + center_size
        x_nchw = x_nchw[:, :, l:r, l:r]
        H = W = center_size
    HW = H * W

    # --- fold BN into the weight / a shift vector ---
    scale = gamma / jnp.sqrt(running_var + eps)            # (C_out,)
    shift = (beta - running_mean * scale).astype(jnp.float32)
    w_folded = conv_w.reshape(C_out, C_in) * scale[:, None]  # (C_out, C_in)

    # --- NCHW kept as-is: pure reshape, channels->sublanes, pixels->lanes ---
    x_csp = x_nchw.reshape(N, C_in, HW)                    # (N, C_in, HW)

    if compute_dtype is not None:
        x_csp = x_csp.astype(compute_dtype)
        w_folded = w_folded.astype(compute_dtype)
    else:
        w_folded = w_folded.astype(x_csp.dtype)

    out = pl.pallas_call(
        _adjust_kernel,
        out_shape=jax.ShapeDtypeStruct((N, C_out, HW), out_dtype),
        grid_spec=pltpu.PrefetchScalarGridSpec(
            num_scalar_prefetch=0,
            grid=(N,),  # one image per grid step; >=2 steps keeps both v7x TCs busy
            in_specs=[
                pl.BlockSpec((C_out, C_in), lambda n: (0, 0)),        # resident weight
                pl.BlockSpec((None, C_in, HW), lambda n: (n, 0, 0)),  # per-image pixels
                pl.BlockSpec((C_out, 1), lambda n: (0, 0)),           # BN shift
            ],
            out_specs=pl.BlockSpec((None, C_out, HW), lambda n: (n, 0, 0)),
        ),
        compiler_params=pltpu.CompilerParams(
            dimension_semantics=("parallel",)),
    )(w_folded, x_csp, shift.reshape(C_out, 1))

    # pure reshape back to NCHW (no transpose needed in this layout)
    return out.reshape(N, C_out, H, W)


def _reference(x_nchw, conv_w, gamma, beta, running_mean, running_var,
               center_size=7, eps=1e-5):
    # pure-JAX reference (eval-mode BN) matching the PyTorch module
    y = jnp.einsum('nchw,oc->nohw', x_nchw, conv_w.reshape(conv_w.shape[0], -1))
    scale = gamma / jnp.sqrt(running_var + eps)
    shift = beta - running_mean * scale
    y = y * scale[None, :, None, None] + shift[None, :, None, None]
    if y.shape[3] < 20:
        l = (y.shape[3] - center_size) // 2
        r = l + center_size
        y = y[:, :, l:r, l:r]
    return y


if __name__ == "__main__":
    # Small shapes consistent with the module: NCHW input, spatial < 20 so the
    # center-crop branch is exercised.
    N, C_in, H, W = 2, 8, 16, 16
    C_out = 16
    center_size = 7

    key = jax.random.PRNGKey(0)
    kx, kw, kg, kb, km, kv = jax.random.split(key, 6)

    x = jax.random.normal(kx, (N, C_in, H, W), dtype=jnp.float32)
    conv_w = jax.random.normal(kw, (C_out, C_in, 1, 1), dtype=jnp.float32) * 0.1
    gamma = jax.random.uniform(kg, (C_out,), dtype=jnp.float32, minval=0.5, maxval=1.5)
    beta = jax.random.normal(kb, (C_out,), dtype=jnp.float32) * 0.1
    running_mean = jax.random.normal(km, (C_out,), dtype=jnp.float32) * 0.1
    running_var = jax.random.uniform(kv, (C_out,), dtype=jnp.float32,
                                     minval=0.5, maxval=1.5)
    # NOTE: BatchNorm is implemented in eval mode (running statistics), the
    # standard inference semantics for this neck module.

    out = adjust_layer_forward(x, conv_w, gamma, beta, running_mean, running_var,
                               center_size=center_size)
    out = jax.block_until_ready(out)

    ref = _reference(x, conv_w, gamma, beta, running_mean, running_var,
                     center_size=center_size)
    assert out.shape == (N, C_out, center_size, center_size), out.shape
    assert jnp.allclose(out, ref, atol=1e-4, rtol=1e-4), "mismatch vs reference"

    print("KERNEL_OK")
</pallas_src>

<mosaic_0001>
module attributes {stable_mosaic.version = 11 : i64} {
  func.func @_adjust_kernel(%arg0: i32, %arg1: memref<16x8xf32, #tpu.memory_space<vmem>>, %arg2: memref<1x8x49xf32, #tpu.memory_space<vmem>>, %arg3: memref<16x1xf32, #tpu.memory_space<vmem>>, %arg4: memref<1x16x49xf32, #tpu.memory_space<vmem>>) attributes {dimension_semantics = [#tpu.dimension_semantics<parallel>], iteration_bounds = array<i64: 2>, scalar_prefetch = 0 : i64, scratch_operands = 0 : i64, tpu.core_type = #tpu.core_type<tc>, window_params = [{pipeline_mode = #tpu.pipeline_mode<synchronous>, transform_indices = @transform_0, window_bounds = array<i64: 16, 8>}, {transform_indices = @transform_1, window_bounds = array<i64: 1, 8, 49>}, {pipeline_mode = #tpu.pipeline_mode<synchronous>, transform_indices = @transform_2, window_bounds = array<i64: 16, 1>}, {transform_indices = @transform_3, window_bounds = array<i64: 1, 16, 49>}]} {
    %c0 = arith.constant 0 : index
    %c0_0 = arith.constant 0 : index
    %0 = vector.load %arg1[%c0, %c0_0] : memref<16x8xf32, #tpu.memory_space<vmem>>, vector<16x8xf32>
    %c0_1 = arith.constant 0 : index
    %c0_2 = arith.constant 0 : index
    %c0_3 = arith.constant 0 : index
    %1 = vector.load %arg2[%c0_1, %c0_2, %c0_3] : memref<1x8x49xf32, #tpu.memory_space<vmem>>, vector<1x8x49xf32>
    %2 = vector.shape_cast %1 : vector<1x8x49xf32> to vector<8x49xf32>
    %cst = arith.constant dense<0.000000e+00> : vector<16x49xf32>
    %3 = tpu.matmul %0, %2, %cst {dimension_numbers = #tpu.dot_dimension_numbers<[1], [0], [0], [1], [0, 0, 1, 1], [], []>} : vector<16x8xf32>, vector<8x49xf32>, vector<16x49xf32> -> vector<16x49xf32>
    %c0_4 = arith.constant 0 : index
    %c0_5 = arith.constant 0 : index
    %4 = vector.load %arg3[%c0_4, %c0_5] : memref<16x1xf32, #tpu.memory_space<vmem>>, vector<16x1xf32>
    %5 = vector.broadcast %4 : vector<16x1xf32> to vector<16x49xf32>
    %6 = arith.addf %3, %5 : vector<16x49xf32>
    %c0_6 = arith.constant 0 : index
    %c0_7 = arith.constant 0 : index
    %c0_8 = arith.constant 0 : index
    %7 = vector.load %arg4[%c0_6, %c0_7, %c0_8] : memref<1x16x49xf32, #tpu.memory_space<vmem>>, vector<1x16x49xf32>
    %8 = vector.shape_cast %7 : vector<1x16x49xf32> to vector<16x49xf32>
    %9 = vector.shape_cast %6 : vector<16x49xf32> to vector<1x16x49xf32>
    tpu.vector_store %arg4[%c0_6, %c0_7, %c0_8], %9 {strides = array<i32>} : memref<1x16x49xf32, #tpu.memory_space<vmem>>, vector<1x16x49xf32>,
    return
  }
  func.func @transform_0(%arg0: i32) -> (i32, i32) {
    %c0_i32 = arith.constant 0 : i32
    %c0_i32_0 = arith.constant 0 : i32
    %c0_i32_1 = arith.constant 0 : i32
    return %c0_i32, %c0_i32_0 : i32, i32
  }
  func.func @transform_1(%arg0: i32) -> (i32, i32, i32) {
    %c0_i32 = arith.constant 0 : i32
    %c0_i32_0 = arith.constant 0 : i32
    %c0_i32_1 = arith.constant 0 : i32
    return %arg0, %c0_i32, %c0_i32_0 : i32, i32, i32
  }
  func.func @transform_2(%arg0: i32) -> (i32, i32) {
    %c0_i32 = arith.constant 0 : i32
    %c0_i32_0 = arith.constant 0 : i32
    %c0_i32_1 = arith.constant 0 : i32
    return %c0_i32, %c0_i32_0 : i32, i32
  }
  func.func @transform_3(%arg0: i32) -> (i32, i32, i32) {
    %c0_i32 = arith.constant 0 : i32
    %c0_i32_0 = arith.constant 0 : i32
    %c0_i32_1 = arith.constant 0 : i32
    return %arg0, %c0_i32, %c0_i32_0 : i32, i32, i32
  }
}

</mosaic_0001>

<bundles_post_ra>
// kernel: tpu_custom_call.1
= control target key start
LH: loop header
LB: loop body
LE: loop exit
PB: predicated region body
PF: predicated region fallthrough
CT: control target
= control target key end

     0   :  { %8 = vsyncpa [#allocation3], 0  ;;  %s607_s0 = inlined_call_operand.vmem [shape: f32[16,8], index: 0, kind: input, shape index: {}]   ;;  %s608_s1 = inlined_call_operand.vmem [shape: f32[2,8,49], index: 1, kind: input, shape index: {}]   ;;  %s609_s2 = inlined_call_operand.vmem [shape: f32[16,1], index: 2, kind: input, shape index: {}]   ;;  %s610_s3 = inlined_call_operand.hbm [shape: f32[2,16,49], index: 3, kind: output, shape index: {}]  }
   0x1   :  { %10 = vsyncpa [#allocation3 + $0x1], 0  ;;  %s493_s12 = smov 0   ;;  %s495_s13 = smov 0  }
   0x2   :  { %s497_s14 = smov 0   ;;  %s499_s15 = smov 0  }
   0x3 LB: > { %s514_s16 = sadd.s32 4294967295, %s467_s15   ;;  %s342_s17 = sadd.s32 4294967294, %s467_s15   ;;  %s467_s15 = sphi %s499_s15, %s616_s15   ;;  %s463_s14 = sphi %s497_s14, %s615_s14   ;;  %s459_s13 = sphi %s495_s13, %s614_s13   ;;  %s455_s12 = sphi %s493_s12, %s613_s12  }
   0x4   : > { %s518_s18 = sadd.s32 1, %s467_s15   ;;  %s91_s19 = sadd.s32 1, %s463_s14 }
   0x5   : > { %s88_s20 = ssub.s32 %s467_s15, %s518_s18  ;;  %p101_p0 = scmp.ne.s32.totalorder %s463_s14, %s459_s13 }
   0x6   : > { %p89_p1 = scmp.eq.s32.totalorder %s88_s20, 0  ;;  %p102_p2 = scmp.eq.s32.totalorder %s514_s16, 1 }
   0x7   : > { %p107_p3 = scmp.ne.s32.totalorder %s459_s13, %s455_s12  ;;  %p108_p4 = scmp.eq.s32.totalorder %s342_s17, 1 }
   0x8   : > { %s529_s21 = scalar_select %p89_p1, %s463_s14, %s91_s19  }
   0x9   : > { %p531_p5 = por %p102_p2, %p101_p0  ;;  %p535_p6 = por %p108_p4, %p107_p3 }
   0xa   : > { %p345_p7 = scmp.ge.s32.totalorder %s467_s15, 1  ;;  %p139_p8 = scmp.lt.s32.totalorder %s467_s15, 3 }
   0xc   : > { %p140_p9 = pnand %p345_p7, %p139_p8 }
   0xd   : > { %p162_p10 = scmp.lt.s32.totalorder (!%p140_p9), %s514_s16, 1  ;;  %s159_s10 = sand.u32 (!%p140_p9), 1, %s459_s13  }
   0xe   : > { %143 = sbr.rel (%p140_p9) target bundleno = 237 (0xed), region = 32  ;;  %s346_s11 = sshll.u32 (!%p140_p9), %s159_s10, 4 }
   0xf   : > { %s161_s17 = scalar_lea.vmem (!%p140_p9), [#allocation2], %s346_s11  ;;  %s355_s20 = sshll.u32 (!%p140_p9), %s514_s16, 8 }
  0x10   : > { %s280_s19 = sshll.u32 (!%p140_p9), %s161_s17, 4  ;;  %s565_s26 = scalar_lea.hbm (!%p140_p9), %s610_s3, %s355_s20  ;;  %s560_s19 = int_to_ptr.vmem [resolvable:$true] %s280_s19 }
  0x11   : > { %s567_s27 = scalar_lea.sflag (!%p140_p9), [#allocation3], %s159_s10 }
  0x13   : > { %v166_v0 = vld [vmem:[%s607_s0] sm:$0xff]  ;;  %vm181_vm0 = vcmask 64512   ;;  %v469_v2 = vmov 0   ;;  %s163_s28 = scalar_select %p162_p10, %s514_s16, 1  ;;  %v170_v3 = vld [vmem:[%s609_s2 + $0x8] sm:$0xff]  ;;  %vm263_vm1 = vcmask 400384  }
  0x14   : > { %v169_v1 = vld [vmem:[%s609_s2] sm:$0xff]  ;;  %361 = vmatprep.mubr.msk.f32.mxu0 %vm181_vm0, %v166_v0  ;;  %406 = vset.pattern.permute.xlu0 %v469_v2  ;;  %v167_v5 = vld [vmem:[%s607_s0 + $0x8] sm:$0xff]  ;;  %s407_s16 = scalar_lea.vmem %s560_s19, 256 }
  0x15   : > { %173 = vperm.xlu0 %406, %v169_v1   ;;  %s347_s4 = sshll.u32 %s163_s28, 3  ;;  %p408_p11 = scmp.ne.s32.totalorder %s560_s19, %s407_s16 }
  0x16   : > { %s165_s7 = scalar_lea.vmem %s608_s1, %s347_s4  ;;  %s470_s28 = smov [#allocation2]  }
  0x17   : > { %v168_v4 = vld [vmem:[%s165_s7] sm:$0xff]  ;;  %p409_p12 = pnand %p408_p11, %p531_p5  ;;  %s411_s29 = sshll.u32 %s470_s28, 4  ;;  %s412_s29 = int_to_ptr.vmem [resolvable:$false] %s411_s29 }
  0x18   : > { %359 = vmatprep.subr.mxu0 %v168_v4  ;;  %s413_s30 = scalar_lea.vmem %s412_s29, 512  ;;  %p414_p0 = scmp.lt.s32.totalorder %s560_s19, %s412_s29 }
  0x19   : > { %178 = vperm.xlu0 %406, %v170_v3   ;;  %360 = vmatpush3.msra.mxu0 %v168_v4  ;;  %p410_p13 = pneg %p409_p12  ;;  %p415_p1 = scmp.lt.s32.totalorder %s413_s30, %s407_s16 }
  0x1a   : > { %362 = vmatmul.mubr.msk.f32.vlgmr.msra.gmra.mxu0 %vm181_vm0, %v167_v5 }
  0x1b   : > { %p416_p2 = por %p415_p1, %p414_p0 }
  0x1d   : > { %p417_p3 = pnand %p416_p2, %p410_p13 }
  0x90   : > { %v174_v6 = vpop.permute.xlu0 %173 }
  0x94   : > { %v179_v7 = vpop.permute.xlu0 %178 }
  0xda   : > { %v363_v8 = vpop.f32.mrf.mxu0 }
  0xdb   : > { %v260_v9 = vadd.f32 %v363_v8, %v179_v7 }
  0xdc   : > { %v254_v10 = vpop.f32.mrf.mxu0 }
  0xdd   : > { %265 = vst.msk [vmem:[%s161_s17 + $0x8] sm:$0xff] %vm263_vm1, %v260_v9  ;;  %v255_v11 = vadd.f32 %v254_v10, %v174_v6 }
  0xdf   : > { %264 = vst.msk [vmem:[%s161_s17] sm:$0xff] %vm263_vm1, %v255_v11 }
  0xe0   : > { %420 = shalt.err (!%p417_p3)
}
  0xe1   : > { %s421_s4 = scalar_lea.hbm %s565_s26, 256  ;;  %s425_s7 = scalar_lea.hbm %s610_s3, 512 }
  0xe2   : > { %p422_p4 = scmp.ne.s32.totalorder %s565_s26, %s421_s4  ;;  %p426_p9 = scmp.lt.s32.totalorder %s565_s26, %s610_s3 }
  0xe3   : > { %p427_p10 = scmp.lt.s32.totalorder %s425_s7, %s421_s4 }
  0xe4   : > { %p423_p7 = pnand %p422_p4, %p531_p5 }
  0xe5   : > { %p428_p11 = por %p427_p10, %p426_p9 }
  0xe6   : > { %p424_p8 = pneg %p423_p7 }
  0xe8   : > { %p429_p12 = pnand %p428_p11, %p424_p8 }
  0xea   : > { %432 = shalt.err (!%p429_p12)
}
  0xeb   : > { %s471_s10 = smov 128   ;;  %s472_s11 = smov 8  }
  0xec   : > { %364 = dma.vmem_to_hbm [thread:$0]  (%p531_p5), %s560_s19, 256, %s565_s26, %s567_s27, %s471_s10, %s471_s10, %s472_s11  }
  0xed PF: > { %p370_p13 = scmp.ge.s32.totalorder %s467_s15, 2  ;;  %s295_s17 = sand.u32 1, %s455_s12  }
  0xee   : > { %s296_s20 = scalar_lea.sflag [#allocation3], %s295_s17 }
  0xef   : > { %p367_p0 = pnand %p370_p13, %p535_p6 }
  0xf1   : > { %p368_p1 = pneg %p367_p0 }
  0xf3   : > { %450 = dma.done.wait (%p368_p1), %s296_s20, 256  }
  0xf4   : > { %452 = vsyncadd (%p368_p1), %s296_s20, 4294967040  ;;  %p13_p2 = scmp.ge.s32.totalorder %s518_s18, 4   ;;  %s613_s12 = smov %s459_s13 }
  0xf5   : > { %s614_s13 = smov %s463_s14  ;;  %s615_s14 = smov %s529_s21 }
  0xf6   : > { %s616_s15 = smov %s518_s18  ;;  %15 = sbr.rel (!%p13_p2) target bundleno = 3 (0x3), region = 67 }
  0xfb   :  { %301 = vsyncpa [#allocation3], 1 }
  0xfc   :  { %303 = vsyncpa [#allocation3 + $0x1], 1 }

</bundles_post_ra>
